<compile_context>
chip_gen: v7x
topology: tpu7x:2x2x1
jax: 0.10.0
libtpu: 0.0.40
codegen_flags: <defaults>
</compile_context>

<pallas_src>
import jax
import jax.numpy as jnp
from jax import lax
from jax.experimental import pallas as pl
from jax.experimental.pallas import tpu as pltpu


# ---- fixed per-tile geometry (the module's fc1(256) forces pooled depth 3) ----
NP = 8              # batch rows per tile (sublane-aligned)
PD = 3              # pooled depth after conv1+pool
GP = PD * NP        # (pd, n_local) rows per tile = 24
NWIN = 8            # 2x2x2 max-pool window entries
LANES = 128

# Row offsets inside the packed bf16 weight slab (640, 128)
W1C_OFF, W1C_ROWS = 0, 128      # conv1 im2col weight: features 108->128, cols 64->128
W2C_OFF, W2C_ROWS = 128, 128    # conv2 1x1x1 weight: in-channels 64->128 (zero rows)
W1F_OFF, W1F_ROWS = 256, 256    # fc1 fused (de-interleaved) weight: cols 64->128
W2F_OFF, W2F_ROWS = 512, 128    # fc2 weight: rows 64->128, cols num_domains->128


# ---------------------------------------------------------------------------
# One fused kernel per batch tile of 8 rows.
#   a1_ref : (192, 128) bf16  im2col patches, row = k*24 + pd*8 + n_local
#   w_ref  : (640, 128) bf16  packed weight slab (see offsets above)
#   b_ref  : (8, 128)   f32   bias slab rows: b1c | b2c | b1f | b2f | 0...
#   o_ref  : (8, 128)   f32   softmax output tile (cols >= num_domains are 0)
# ---------------------------------------------------------------------------
def _fused_forward_kernel(a1_ref, w_ref, b_ref, o_ref):
    f32 = jnp.float32
    bf16 = jnp.bfloat16

    b = b_ref[...]                                    # one (8,128) vreg
    b1c, b2c, b1f, b2f = b[0:1, :], b[1:2, :], b[2:3, :], b[3:4, :]

    # ---- conv1: one im2col matmul; 2x2x2 pool = 7 maxima over aligned slabs ----
    z1 = jnp.dot(a1_ref[...], w_ref[pl.ds(W1C_OFF, W1C_ROWS), :],
                 preferred_element_type=f32)          # (192, 128), SSA value
    m1 = z1[0:GP, :]
    for k in range(1, NWIN):                          # VPU, static unroll
        m1 = jnp.maximum(m1, z1[k * GP:(k + 1) * GP, :])
    # bias + ReLU once, after the pool (exact: per-column bias, monotone ReLU)
    p1 = jnp.maximum(m1 + b1c, 0.0)                   # (24, 128)

    # ---- conv2 (1x1x1, pad=1): real voxels only; zero-padding voxels of each
    #      pool window collapse into a single max(., 0) before bias/ReLU ----
    z2 = jnp.dot(p1.astype(bf16), w_ref[pl.ds(W2C_OFF, W2C_ROWS), :],
                 preferred_element_type=f32)          # (24, 128)
    d0 = jnp.maximum(jnp.maximum(z2[0:NP, :], 0.0) + b2c, 0.0)           # (8,128)
    d1 = jnp.maximum(z2[NP:2 * NP, :], z2[2 * NP:3 * NP, :])
    d1 = jnp.maximum(jnp.maximum(d1, 0.0) + b2c, 0.0)                    # (8,128)

    # ---- fc1 + ReLU: flatten folded into de-interleaved weights, one K=256 dot ----
    x1 = jnp.concatenate([d0, d1], axis=1).astype(bf16)                  # (8, 256)
    h = jnp.maximum(jnp.dot(x1, w_ref[pl.ds(W1F_OFF, W1F_ROWS), :],
                            preferred_element_type=f32) + b1f, 0.0)      # (8, 128)

    # ---- fc2 + softmax (lane-dense; padded logit columns get -1e30 -> exp 0) ----
    logits = jnp.dot(h.astype(bf16), w_ref[pl.ds(W2F_OFF, W2F_ROWS), :],
                     preferred_element_type=f32) + b2f                   # (8, 128)
    m = jnp.max(logits, axis=1, keepdims=True)
    e = jnp.exp(logits - m)
    o_ref[...] = e / jnp.sum(e, axis=1, keepdims=True)


# ---------------------------------------------------------------------------
# Wrapper: im2col / weight repack (tiny, fused by XLA under jit) + one pallas_call
# ---------------------------------------------------------------------------
def domain_classifier_forward(x, params):
    """x: (N, C, D, H, W) float32, PyTorch NCDHW layout."""
    N, C, D, H, W = x.shape
    oD, oH, oW = D - 2, H - 2, W - 2            # conv1 valid-output extents
    pD = oD // 2                                # MaxPool3d(2) output depth
    # Geometry the PyTorch module needs to reach fc1(256): pooled H=W=1, pD=3.
    assert oH == 2 and oW == 2 and oD % 2 == 0 and pD == PD, (
        "input shape must match the fc1(256) geometry of the PyTorch module")
    feat = C * 27
    assert feat <= LANES, "padded im2col feature dim is fixed at 128"
    num_domains = params["w_fc2"].shape[0]
    assert num_domains <= LANES

    T = -(-N // NP)                             # batch tiles of 8 rows
    NPAD = T * NP
    bf16 = jnp.bfloat16

    # ---- im2col for conv1 (k=3, valid), row = t*192 + k*24 + pd*8 + n_local ----
    # feature index f = c*27 + kd*9 + kh*3 + kw (matches w_conv1.reshape(64,-1))
    # TODO(synk): for large batch, build the im2col inside the kernel from an x
    # tile in VMEM so x is read from HBM once instead of materializing this
    # ~5x-expanded patch array; negligible at the tested sizes.
    cols = jnp.stack(
        [x[:, :, kd:kd + oD, kh:kh + oH, kw:kw + oW]
         for kd in range(3) for kh in range(3) for kw in range(3)],
        axis=-1)                                             # (N, C, oD, 2, 2, 27)
    pat = jnp.transpose(cols, (0, 2, 3, 4, 1, 5)).reshape(N, oD, 2, 2, feat)
    pat = pat.reshape(N, PD, 2, 2, 2, feat)                  # od = 2*pd + dd
    pat = jnp.transpose(pat, (2, 3, 4, 1, 0, 5))             # (dd, hh, ww, pd, n, f)
    pat = pat.reshape(NWIN, PD, N, feat)                     # k = dd*4 + hh*2 + ww
    pat = jnp.pad(pat, ((0, 0), (0, 0), (0, NPAD - N), (0, LANES - feat)))
    pat = pat.reshape(NWIN, PD, T, NP, LANES)
    pat = jnp.transpose(pat, (2, 0, 1, 3, 4))                # (T, k, pd, n_local, f)
    a1 = pat.reshape(T * NWIN * GP, LANES).astype(bf16)      # (T*192, 128) lane-dense

    # ---- packed weight slab (one-off; trivially small) ----
    w1c = jnp.pad(params["w_conv1"].reshape(64, feat).T,
                  ((0, LANES - feat), (0, LANES - 64)))          # (128, 128)
    w2c = jnp.pad(params["w_conv2"].reshape(128, 64).T,
                  ((0, LANES - 64), (0, 0)))                     # (128, 128)
    w1t = params["w_fc1"].T                                      # (256, 64) row j = 2c+pd2
    w1f = jnp.pad(jnp.concatenate([w1t[0::2], w1t[1::2]], axis=0),
                  ((0, 0), (0, LANES - 64)))                     # (256, 128)
    w2f = jnp.pad(params["w_fc2"].T,
                  ((0, LANES - 64), (0, LANES - num_domains)))   # (128, 128)
    wslab = jnp.concatenate([w1c, w2c, w1f, w2f], axis=0).astype(bf16)   # (640, 128)

    # ---- packed bias slab: one (8,128) f32 tile ----
    bslab = jnp.zeros((8, LANES), jnp.float32)
    bslab = bslab.at[0, :64].set(params["b_conv1"])
    bslab = bslab.at[1, :].set(params["b_conv2"])
    bslab = bslab.at[2, :64].set(params["b_fc1"])
    bslab = bslab.at[3, :num_domains].set(params["b_fc2"])
    bslab = bslab.at[3, num_domains:].set(-1e30)                 # padded logits -> exp 0

    out = pl.pallas_call(
        _fused_forward_kernel,
        out_shape=jax.ShapeDtypeStruct((T * NP, LANES), jnp.float32),
        grid=(T,),
        in_specs=[
            pl.BlockSpec((NWIN * GP, LANES), lambda t: (t, 0)),  # per-tile im2col rows
            pl.BlockSpec((640, LANES), lambda t: (0, 0)),        # weight slab (resident)
            pl.BlockSpec((8, LANES), lambda t: (0, 0)),          # bias slab (resident)
        ],
        out_specs=pl.BlockSpec((NP, LANES), lambda t: (t, 0)),
        compiler_params=pltpu.CompilerParams(
            dimension_semantics=("parallel",)),                  # v7x: 2 TCs split batch
    )(a1, wslab, bslab)
    return out[:N, :num_domains]


# ---------------------------------------------------------------------------
# Pure-JAX (XLA) reference, op-for-op mirror of the PyTorch module
# ---------------------------------------------------------------------------
def reference_forward(x, params):
    dn = ("NCDHW", "OIDHW", "NCDHW")
    y = lax.conv_general_dilated(x, params["w_conv1"], (1, 1, 1), "VALID",
                                 dimension_numbers=dn)
    y = jnp.maximum(y + params["b_conv1"].reshape(1, -1, 1, 1, 1), 0.0)
    y = lax.reduce_window(y, -jnp.inf, lax.max, (1, 1, 2, 2, 2), (1, 1, 2, 2, 2), "VALID")
    y = lax.conv_general_dilated(y, params["w_conv2"], (1, 1, 1),
                                 [(1, 1), (1, 1), (1, 1)], dimension_numbers=dn)
    y = jnp.maximum(y + params["b_conv2"].reshape(1, -1, 1, 1, 1), 0.0)
    y = lax.reduce_window(y, -jnp.inf, lax.max, (1, 1, 2, 2, 2), (1, 1, 2, 2, 2), "VALID")
    y = y.reshape(y.shape[0], -1)
    y = jnp.maximum(y @ params["w_fc1"].T + params["b_fc1"], 0.0)
    y = y @ params["w_fc2"].T + params["b_fc2"]
    return jax.nn.softmax(y, axis=1)


# ---------------------------------------------------------------------------
# Deterministic parameter initialization (same shapes as the PyTorch __init__)
# ---------------------------------------------------------------------------
def init_params(ch_in, num_domains, key):
    ks = jax.random.split(key, 8)
    s = 0.05
    return {
        "w_conv1": jax.random.normal(ks[0], (64, ch_in, 3, 3, 3), jnp.float32) * s,
        "b_conv1": jax.random.normal(ks[1], (64,), jnp.float32) * s,
        "w_conv2": jax.random.normal(ks[2], (128, 64, 1, 1, 1), jnp.float32) * s,
        "b_conv2": jax.random.normal(ks[3], (128,), jnp.float32) * s,
        "w_fc1": jax.random.normal(ks[4], (64, 256), jnp.float32) * s,
        "b_fc1": jax.random.normal(ks[5], (64,), jnp.float32) * s,
        "w_fc2": jax.random.normal(ks[6], (num_domains, 64), jnp.float32) * s,
        "b_fc2": jax.random.normal(ks[7], (num_domains,), jnp.float32) * s,
    }


if __name__ == "__main__":
    key = jax.random.PRNGKey(0)
    kx, kp = jax.random.split(key)

    CH_IN, NUM_DOMAINS = 4, 3
    # NCDHW input chosen so flattened features hit fc1's expected 256:
    # (8,4,4) -conv3-> (6,2,2) -pool-> (3,1,1) -conv1x1,pad1-> (5,3,3) -pool-> (2,1,1); 128*2=256.
    x = jax.random.normal(kx, (2, CH_IN, 8, 4, 4), jnp.float32)
    params = init_params(CH_IN, NUM_DOMAINS, kp)

    fwd = jax.jit(domain_classifier_forward)
    y = jax.block_until_ready(fwd(x, params))
    y_ref = jax.block_until_ready(reference_forward(x, params))

    assert y.shape == (2, NUM_DOMAINS)
    assert bool(jnp.all(jnp.isfinite(y)))
    assert bool(jnp.allclose(jnp.sum(y, axis=1), 1.0, atol=1e-3))   # exact divide
    assert bool(jnp.allclose(y, y_ref, atol=2e-2))                  # bf16-MXU tolerance
    print("KERNEL_OK")
</pallas_src>

<mosaic_0001>
module attributes {stable_mosaic.version = 11 : i64} {
  func.func @_fused_forward_kernel(%arg0: i32, %arg1: memref<192x128xbf16, #tpu.memory_space<vmem>>, %arg2: memref<640x128xbf16, #tpu.memory_space<vmem>>, %arg3: memref<8x128xf32, #tpu.memory_space<vmem>>, %arg4: memref<8x128xf32, #tpu.memory_space<vmem>>) attributes {dimension_semantics = [#tpu.dimension_semantics<parallel>], iteration_bounds = array<i64: 1>, scalar_prefetch = 0 : i64, scratch_operands = 0 : i64, tpu.core_type = #tpu.core_type<tc>, window_params = [{transform_indices = @transform_0, window_bounds = array<i64: 192, 128>}, {pipeline_mode = #tpu.pipeline_mode<synchronous>, transform_indices = @transform_1, window_bounds = array<i64: 640, 128>}, {pipeline_mode = #tpu.pipeline_mode<synchronous>, transform_indices = @transform_2, window_bounds = array<i64: 8, 128>}, {transform_indices = @transform_3, window_bounds = array<i64: 8, 128>}]} {
    %c0 = arith.constant 0 : index
    %c0_0 = arith.constant 0 : index
    %0 = vector.load %arg3[%c0, %c0_0] : memref<8x128xf32, #tpu.memory_space<vmem>>, vector<8x128xf32>
    %1 = vector.extract_strided_slice %0 {offsets = [0, 0], sizes = [1, 128], strides = [1, 1]} : vector<8x128xf32> to vector<1x128xf32>
    %2 = vector.extract_strided_slice %0 {offsets = [1, 0], sizes = [1, 128], strides = [1, 1]} : vector<8x128xf32> to vector<1x128xf32>
    %3 = vector.extract_strided_slice %0 {offsets = [2, 0], sizes = [1, 128], strides = [1, 1]} : vector<8x128xf32> to vector<1x128xf32>
    %4 = vector.extract_strided_slice %0 {offsets = [3, 0], sizes = [1, 128], strides = [1, 1]} : vector<8x128xf32> to vector<1x128xf32>
    %c0_1 = arith.constant 0 : index
    %c0_2 = arith.constant 0 : index
    %5 = vector.load %arg1[%c0_1, %c0_2] : memref<192x128xbf16, #tpu.memory_space<vmem>>, vector<192x128xbf16>
    %c0_3 = arith.constant 0 : index
    %c0_4 = arith.constant 0 : index
    %6 = vector.load %arg2[%c0_3, %c0_4] : memref<640x128xbf16, #tpu.memory_space<vmem>>, vector<128x128xbf16>
    %cst = arith.constant dense<0.000000e+00> : vector<192x128xf32>
    %7 = tpu.matmul %5, %6, %cst {dimension_numbers = #tpu.dot_dimension_numbers<[1], [0], [0], [1], [0, 0, 1, 1], [], []>} : vector<192x128xbf16>, vector<128x128xbf16>, vector<192x128xf32> -> vector<192x128xf32>
    %8 = vector.extract_strided_slice %7 {offsets = [0, 0], sizes = [24, 128], strides = [1, 1]} : vector<192x128xf32> to vector<24x128xf32>
    %9 = vector.extract_strided_slice %7 {offsets = [24, 0], sizes = [24, 128], strides = [1, 1]} : vector<192x128xf32> to vector<24x128xf32>
    %10 = arith.maximumf %8, %9 : vector<24x128xf32>
    %11 = vector.extract_strided_slice %7 {offsets = [48, 0], sizes = [24, 128], strides = [1, 1]} : vector<192x128xf32> to vector<24x128xf32>
    %12 = arith.maximumf %10, %11 : vector<24x128xf32>
    %13 = vector.extract_strided_slice %7 {offsets = [72, 0], sizes = [24, 128], strides = [1, 1]} : vector<192x128xf32> to vector<24x128xf32>
    %14 = arith.maximumf %12, %13 : vector<24x128xf32>
    %15 = vector.extract_strided_slice %7 {offsets = [96, 0], sizes = [24, 128], strides = [1, 1]} : vector<192x128xf32> to vector<24x128xf32>
    %16 = arith.maximumf %14, %15 : vector<24x128xf32>
    %17 = vector.extract_strided_slice %7 {offsets = [120, 0], sizes = [24, 128], strides = [1, 1]} : vector<192x128xf32> to vector<24x128xf32>
    %18 = arith.maximumf %16, %17 : vector<24x128xf32>
    %19 = vector.extract_strided_slice %7 {offsets = [144, 0], sizes = [24, 128], strides = [1, 1]} : vector<192x128xf32> to vector<24x128xf32>
    %20 = arith.maximumf %18, %19 : vector<24x128xf32>
    %21 = vector.extract_strided_slice %7 {offsets = [168, 0], sizes = [24, 128], strides = [1, 1]} : vector<192x128xf32> to vector<24x128xf32>
    %22 = arith.maximumf %20, %21 : vector<24x128xf32>
    %23 = vector.broadcast %1 : vector<1x128xf32> to vector<24x128xf32>
    %24 = arith.addf %22, %23 : vector<24x128xf32>
    %cst_5 = arith.constant 0.000000e+00 : f32
    %25 = vector.broadcast %cst_5 : f32 to vector<24x128xf32>
    %26 = arith.maximumf %24, %25 : vector<24x128xf32>
    %27 = arith.truncf %26 : vector<24x128xf32> to vector<24x128xbf16>
    %c128 = arith.constant 128 : index
    %c0_6 = arith.constant 0 : index
    %28 = vector.load %arg2[%c128, %c0_6] : memref<640x128xbf16, #tpu.memory_space<vmem>>, vector<128x128xbf16>
    %cst_7 = arith.constant dense<0.000000e+00> : vector<24x128xf32>
    %29 = tpu.matmul %27, %28, %cst_7 {dimension_numbers = #tpu.dot_dimension_numbers<[1], [0], [0], [1], [0, 0, 1, 1], [], []>} : vector<24x128xbf16>, vector<128x128xbf16>, vector<24x128xf32> -> vector<24x128xf32>
    %30 = vector.extract_strided_slice %29 {offsets = [0, 0], sizes = [8, 128], strides = [1, 1]} : vector<24x128xf32> to vector<8x128xf32>
    %cst_8 = arith.constant 0.000000e+00 : f32
    %31 = vector.broadcast %cst_8 : f32 to vector<8x128xf32>
    %32 = arith.maximumf %30, %31 : vector<8x128xf32>
    %33 = vector.broadcast %2 : vector<1x128xf32> to vector<8x128xf32>
    %34 = arith.addf %32, %33 : vector<8x128xf32>
    %cst_9 = arith.constant 0.000000e+00 : f32
    %35 = vector.broadcast %cst_9 : f32 to vector<8x128xf32>
    %36 = arith.maximumf %34, %35 : vector<8x128xf32>
    %37 = vector.extract_strided_slice %29 {offsets = [8, 0], sizes = [8, 128], strides = [1, 1]} : vector<24x128xf32> to vector<8x128xf32>
    %38 = vector.extract_strided_slice %29 {offsets = [16, 0], sizes = [8, 128], strides = [1, 1]} : vector<24x128xf32> to vector<8x128xf32>
    %39 = arith.maximumf %37, %38 : vector<8x128xf32>
    %cst_10 = arith.constant 0.000000e+00 : f32
    %40 = vector.broadcast %cst_10 : f32 to vector<8x128xf32>
    %41 = arith.maximumf %39, %40 : vector<8x128xf32>
    %42 = vector.broadcast %2 : vector<1x128xf32> to vector<8x128xf32>
    %43 = arith.addf %41, %42 : vector<8x128xf32>
    %cst_11 = arith.constant 0.000000e+00 : f32
    %44 = vector.broadcast %cst_11 : f32 to vector<8x128xf32>
    %45 = arith.maximumf %43, %44 : vector<8x128xf32>
    %46 = tpu.concatenate %36, %45 in 1 : vector<8x128xf32>, vector<8x128xf32> -> vector<8x256xf32>
    %47 = arith.truncf %46 : vector<8x256xf32> to vector<8x256xbf16>
    %c256 = arith.constant 256 : index
    %c0_12 = arith.constant 0 : index
    %48 = vector.load %arg2[%c256, %c0_12] : memref<640x128xbf16, #tpu.memory_space<vmem>>, vector<256x128xbf16>
    %cst_13 = arith.constant dense<0.000000e+00> : vector<8x128xf32>
    %49 = tpu.matmul %47, %48, %cst_13 {dimension_numbers = #tpu.dot_dimension_numbers<[1], [0], [0], [1], [0, 0, 1, 1], [], []>} : vector<8x256xbf16>, vector<256x128xbf16>, vector<8x128xf32> -> vector<8x128xf32>
    %50 = vector.broadcast %3 : vector<1x128xf32> to vector<8x128xf32>
    %51 = arith.addf %49, %50 : vector<8x128xf32>
    %cst_14 = arith.constant 0.000000e+00 : f32
    %52 = vector.broadcast %cst_14 : f32 to vector<8x128xf32>
    %53 = arith.maximumf %51, %52 : vector<8x128xf32>
    %54 = arith.truncf %53 : vector<8x128xf32> to vector<8x128xbf16>
    %c512 = arith.constant 512 : index
    %c0_15 = arith.constant 0 : index
    %55 = vector.load %arg2[%c512, %c0_15] : memref<640x128xbf16, #tpu.memory_space<vmem>>, vector<128x128xbf16>
    %cst_16 = arith.constant dense<0.000000e+00> : vector<8x128xf32>
    %56 = tpu.matmul %54, %55, %cst_16 {dimension_numbers = #tpu.dot_dimension_numbers<[1], [0], [0], [1], [0, 0, 1, 1], [], []>} : vector<8x128xbf16>, vector<128x128xbf16>, vector<8x128xf32> -> vector<8x128xf32>
    %57 = vector.broadcast %4 : vector<1x128xf32> to vector<8x128xf32>
    %58 = arith.addf %56, %57 : vector<8x128xf32>
    %cst_17 = arith.constant dense<0xFF800000> : vector<8xf32>
    %59 = vector.multi_reduction <maximumf>, %58, %cst_17 [1] : vector<8x128xf32> to vector<8xf32>
    %60 = vector.shape_cast %59 : vector<8xf32> to vector<8x1xf32>
    %61 = vector.broadcast %60 : vector<8x1xf32> to vector<8x128xf32>
    %62 = arith.subf %58, %61 : vector<8x128xf32>
    %63 = math.exp %62 : vector<8x128xf32>
    %cst_18 = arith.constant dense<0.000000e+00> : vector<8xf32>
    %64 = vector.multi_reduction <add>, %63, %cst_18 [1] : vector<8x128xf32> to vector<8xf32>
    %65 = vector.shape_cast %64 : vector<8xf32> to vector<8x1xf32>
    %66 = vector.broadcast %65 : vector<8x1xf32> to vector<8x128xf32>
    %67 = arith.divf %63, %66 : vector<8x128xf32>
    %c0_19 = arith.constant 0 : index
    %c0_20 = arith.constant 0 : index
    %68 = vector.load %arg4[%c0_19, %c0_20] : memref<8x128xf32, #tpu.memory_space<vmem>>, vector<8x128xf32>
    tpu.vector_store %arg4[%c0_19, %c0_20], %67 {strides = array<i32>} : memref<8x128xf32, #tpu.memory_space<vmem>>, vector<8x128xf32>,
    return
  }
  func.func @transform_0(%arg0: i32) -> (i32, i32) {
    %c0_i32 = arith.constant 0 : i32
    %c0_i32_0 = arith.constant 0 : i32
    return %arg0, %c0_i32 : i32, i32
  }
  func.func @transform_1(%arg0: i32) -> (i32, i32) {
    %c0_i32 = arith.constant 0 : i32
    %c0_i32_0 = arith.constant 0 : i32
    %c0_i32_1 = arith.constant 0 : i32
    return %c0_i32, %c0_i32_0 : i32, i32
  }
  func.func @transform_2(%arg0: i32) -> (i32, i32) {
    %c0_i32 = arith.constant 0 : i32
    %c0_i32_0 = arith.constant 0 : i32
    %c0_i32_1 = arith.constant 0 : i32
    return %c0_i32, %c0_i32_0 : i32, i32
  }
  func.func @transform_3(%arg0: i32) -> (i32, i32) {
    %c0_i32 = arith.constant 0 : i32
    %c0_i32_0 = arith.constant 0 : i32
    return %arg0, %c0_i32 : i32, i32
  }
}

</mosaic_0001>

<bundles_post_ra>
// kernel: domain_classifier_forward.1
= control target key start
LH: loop header
LB: loop body
LE: loop exit
PB: predicated region body
PF: predicated region fallthrough
CT: control target
= control target key end

     0   :  { %v326_v58 = vlaneseq  ;;  %vm1011_vm0 = vmmov 0   ;;  %s1206_s1 = inlined_call_operand.vmem [shape: bf16[640,128], index: 1, kind: input, shape index: {}]   ;;  %s1207_s0 = inlined_call_operand.vmem [shape: bf16[192,128], index: 0, kind: input, shape index: {}]   ;;  %s1208_s2 = inlined_call_operand.vmem [shape: f32[8,128], index: 2, kind: input, shape index: {}]   ;;  %s1209_s3 = inlined_call_operand.vmem [shape: f32[8,128], index: 3, kind: output, shape index: {}]  }
   0x1   :  { %v954_v0 = vld [vmem:[%s1206_s1] sm:$0xff]   ;;  %v955_v1 = vld [vmem:[%s1206_s1 + $0x8] sm:$0xff]   ;;  %v956_v2 = vld [vmem:[%s1206_s1 + $0x10] sm:$0xff]  }
   0x2   :  { %872 = vmatprep.subr.bf16.mxu0 %v954_v0  ;;  %v957_v3 = vld [vmem:[%s1206_s1 + $0x18] sm:$0xff]   ;;  %v962_v4 = vld [vmem:[%s1207_s0] sm:$0xff]   ;;  %v959_v6 = vld [vmem:[%s1206_s1 + $0x28] sm:$0xff]   ;;  %v1119_v60 = vshrl.u32 %v326_v58, 7 }
   0x3   :  { %873 = vmatpush3.bf16.msra.mxu0 %v954_v0  ;;  %888 = vmatprep.mubr.bf16.mxu0 %v962_v4  ;;  %v958_v5 = vld [vmem:[%s1206_s1 + $0x20] sm:$0xff]   ;;  %v960_v7 = vld [vmem:[%s1206_s1 + $0x30] sm:$0xff]   ;;  %v961_v8 = vld [vmem:[%s1206_s1 + $0x38] sm:$0xff]  }
   0x4   :  { %874 = vmatprep.subr.bf16.mxu0 %v955_v1  ;;  %v963_v9 = vld [vmem:[%s1207_s0 + $0x8] sm:$0xff]   ;;  %v964_v10 = vld [vmem:[%s1207_s0 + $0x10] sm:$0xff]   ;;  %v965_v11 = vld [vmem:[%s1207_s0 + $0x18] sm:$0xff]   ;;  %v328_v4 = vsub.s32 0, %v1119_v60 }
   0x5   :  { %v966_v12 = vld [vmem:[%s1207_s0 + $0x20] sm:$0xff]   ;;  %v967_v13 = vld [vmem:[%s1207_s0 + $0x28] sm:$0xff]   ;;  %v968_v14 = vld [vmem:[%s1207_s0 + $0x30] sm:$0xff]  }
   0x6   :  { %v969_v15 = vld [vmem:[%s1207_s0 + $0x38] sm:$0xff]   ;;  %v970_v16 = vld [vmem:[%s1207_s0 + $0x40] sm:$0xff]   ;;  %v971_v17 = vld [vmem:[%s1207_s0 + $0x48] sm:$0xff]  }
   0x7   :  { %875 = vmatpush3.bf16.msra.mxu0 %v955_v1  ;;  %v972_v18 = vld [vmem:[%s1207_s0 + $0x50] sm:$0xff]   ;;  %v973_v19 = vld [vmem:[%s1207_s0 + $0x58] sm:$0xff]   ;;  %v974_v20 = vld [vmem:[%s1206_s1 + $0x40] sm:$0xff]  }
   0x8   :  { %876 = vmatprep.subr.bf16.mxu0 %v956_v2  ;;  %912 = vmatprep.subr.bf16.mxu1 %v974_v20  ;;  %v975_v21 = vld [vmem:[%s1206_s1 + $0x48] sm:$0xff]   ;;  %v976_v22 = vld [vmem:[%s1206_s1 + $0x50] sm:$0xff]   ;;  %v977_v23 = vld [vmem:[%s1206_s1 + $0x58] sm:$0xff]  }
   0x9   :  { %913 = vmatpush3.bf16.msra.mxu1 %v974_v20  ;;  %v978_v24 = vld [vmem:[%s1206_s1 + $0x60] sm:$0xff]   ;;  %v979_v25 = vld [vmem:[%s1206_s1 + $0x68] sm:$0xff]   ;;  %v980_v26 = vld [vmem:[%s1206_s1 + $0x70] sm:$0xff]  }
   0xa   :  { %914 = vmatprep.subr.bf16.mxu1 %v975_v21  ;;  %v981_v27 = vld [vmem:[%s1206_s1 + $0x78] sm:$0xff]   ;;  %v982_v28 = vld [vmem:[%s1206_s1 + $0xc0] sm:$0xff]  }
   0xb   :  { %877 = vmatpush3.bf16.msra.mxu0 %v956_v2 }
   0xc   :  { %878 = vmatprep.subr.bf16.mxu0 %v957_v3 }
   0xd   :  { %915 = vmatpush3.bf16.msra.mxu1 %v975_v21 }
   0xe   :  { %916 = vmatprep.subr.bf16.mxu1 %v976_v22 }
   0xf   :  { %879 = vmatpush3.bf16.msra.mxu0 %v957_v3 }
  0x10   :  { %880 = vmatprep.subr.bf16.mxu0 %v958_v5 }
  0x11   :  { %917 = vmatpush3.bf16.msra.mxu1 %v976_v22 }
  0x12   :  { %918 = vmatprep.subr.bf16.mxu1 %v977_v23 }
  0x13   :  { %881 = vmatpush3.bf16.msra.mxu0 %v958_v5  ;;  %v1125_v5 = vld [vmem:[%s1208_s2] sm:$0xff] }
  0x14   :  { %882 = vmatprep.subr.bf16.mxu0 %v959_v6 }
  0x15   :  { %919 = vmatpush3.bf16.msra.mxu1 %v977_v23  ;;  %v983_v23 = vld [vmem:[%s1206_s1 + $0x80] sm:$0xff]  }
  0x16   :  { %920 = vmatprep.subr.bf16.mxu1 %v978_v24 }
  0x17   :  { %883 = vmatpush3.bf16.msra.mxu0 %v959_v6 }
  0x18   :  { %884 = vmatprep.subr.bf16.mxu0 %v960_v7 }
  0x19   :  { %921 = vmatpush3.bf16.msra.mxu1 %v978_v24  ;;  %v984_v24 = vld [vmem:[%s1206_s1 + $0xc8] sm:$0xff]  }
  0x1a   :  { %922 = vmatprep.subr.bf16.mxu1 %v979_v25 }
  0x1b   :  { %885 = vmatpush3.bf16.msra.mxu0 %v960_v7  ;;  %v329_v7 = vrot.slane %v1125_v5, %v328_v4 }
  0x1c   :  { %886 = vmatprep.subr.bf16.mxu0 %v961_v8 }
  0x1d   :  { %923 = vmatpush3.bf16.msra.mxu1 %v979_v25  ;;  %v985_v25 = vld [vmem:[%s1206_s1 + $0x88] sm:$0xff]  }
  0x1e   :  { %924 = vmatprep.subr.bf16.mxu1 %v980_v26 }
  0x1f   :  { %887 = vmatpush3.bf16.msra.mxu0 %v961_v8 }
  0x21   :  { %925 = vmatpush3.bf16.msra.mxu1 %v980_v26  ;;  %v986_v26 = vld [vmem:[%s1206_s1 + $0xd0] sm:$0xff]  }
  0x22   :  { %889 = vmatmul.mubr.bf16.vlgmr.msra.gmra.mrb[0].mxu0 %v963_v9  ;;  %926 = vmatprep.subr.bf16.mxu1 %v981_v27 }
  0x23   :  { %892 = vmatprep.mubr.bf16.mxu0 %v964_v10 }
  0x25   :  { %927 = vmatpush3.bf16.msra.mxu1 %v981_v27  ;;  %v987_v27 = vld [vmem:[%s1206_s1 + $0x90] sm:$0xff]  }
  0x26   :  { %841 = vmatprep.subr.bf16.mxu1 %v982_v28  ;;  %v988_v28 = vld [vmem:[%s1206_s1 + $0xd8] sm:$0xff]  }
  0x2a   :  { %893 = vmatmul.mubr.bf16.gmra.mrb[4].mxu0 %v965_v11 }
  0x2b   :  { %896 = vmatprep.mubr.bf16.mxu0 %v966_v12 }
  0x32   :  { %897 = vmatmul.mubr.bf16.gmra.mrb[8].mxu0 %v967_v13 }
  0x33   :  { %900 = vmatprep.mubr.bf16.mxu0 %v968_v14 }
  0x3a   :  { %901 = vmatmul.mubr.bf16.gmra.mrb[12].mxu0 %v969_v15 }
  0x3b   :  { %904 = vmatprep.mubr.bf16.mxu0 %v970_v16 }
  0x42   :  { %905 = vmatmul.mubr.bf16.gmra.mrb[16].mxu0 %v971_v17 }
  0x43   :  { %908 = vmatprep.mubr.bf16.mxu0 %v972_v18 }
  0x4a   :  { %909 = vmatmul.mubr.bf16.gmra.mrb[20].mxu0 %v973_v19 }
  0xf5   :  { %v890_v29 = vpop.f32.mrb[0].mxu0 }
  0xf6   :  { %v210_v30 = vpop.f32.mrb[1].mxu0 }
  0xf7   :  { %v891_v31 = vpop.f32.mrb[2].mxu0 }
  0xf8   :  { %v305_v32 = vmax.f32 %v210_v30, %v891_v31  ;;  %v213_v33 = vpop.f32.mrb[3].mxu0  ;;  %v990_v30 = vld [vmem:[%s1206_s1 + $0xe0] sm:$0xff]  }
  0xf9   :  { %v991_v31 = vld [vmem:[%s1206_s1 + $0xa0] sm:$0xff]  }
  0xfd   :  { %v894_v34 = vpop.f32.mrb[4].mxu0 }
  0xfe   :  { %v308_v35 = vmax.f32 %v305_v32, %v894_v34  ;;  %v226_v36 = vpop.f32.mrb[5].mxu0  ;;  %v992_v32 = vld [vmem:[%s1206_s1 + $0xe8] sm:$0xff]   ;;  %v994_v34 = vld [vmem:[%s1206_s1 + $0xf0] sm:$0xff]  }
  0xff   :  { %v306_v37 = vmax.f32 %v213_v33, %v226_v36  ;;  %v895_v38 = vpop.f32.mrb[6].mxu0  ;;  %v993_v33 = vld [vmem:[%s1206_s1 + $0xa8] sm:$0xff]   ;;  %v996_v36 = vld [vmem:[%s1206_s1 + $0xf8] sm:$0xff]  }
 0x100   :  { %v229_v39 = vpop.f32.mrb[7].mxu0 }
 0x101   :  { %v309_v40 = vmax.f32 %v306_v37, %v895_v38  ;;  %v307_v41 = vmax.f32 %v890_v29, %v229_v39  ;;  %v989_v29 = vld [vmem:[%s1206_s1 + $0x98] sm:$0xff]   ;;  %v998_v38 = vld [vmem:[%s1206_s1 + $0x100] sm:$0xff]   ;;  %v1010_v39 = vmov 0.0  }
 0x102   :  { %v997_v37 = vld [vmem:[%s1206_s1 + $0xb8] sm:$0xff]   ;;  %932 = vmatprep.subr.bf16.mxu0 %v1010_v39  ;;  %948 = vmatprep.mubr.msk.bf16.mxu0 %vm1011_vm0, %v1010_v39 }
 0x103   :  { %933 = vmatpush3.bf16.msra.mxu0 %v998_v38 }
 0x104   :  { %934 = vmatprep.subr.bf16.mxu0 %v1010_v39 }
 0x105   :  { %v898_v42 = vpop.f32.mrb[8].mxu0 }
 0x106   :  { %v312_v43 = vmax.f32 %v309_v40, %v898_v42  ;;  %v242_v44 = vpop.f32.mrb[9].mxu0  ;;  %v999_v40 = vld [vmem:[%s1206_s1 + $0x108] sm:$0xff]   ;;  %v1001_v42 = vld [vmem:[%s1206_s1 + $0x118] sm:$0xff]  }
 0x107   :  { %v310_v45 = vmax.f32 %v307_v41, %v242_v44  ;;  %v899_v46 = vpop.f32.mrb[10].mxu0  ;;  %935 = vmatpush3.bf16.msra.mxu0 %v999_v40  ;;  %v1000_v41 = vld [vmem:[%s1206_s1 + $0x110] sm:$0xff]   ;;  %v1003_v44 = vld [vmem:[%s1206_s1 + $0x128] sm:$0xff]  }
 0x108   :  { %v245_v47 = vpop.f32.mrb[11].mxu0  ;;  %936 = vmatprep.subr.bf16.mxu0 %v1010_v39 }
 0x109   :  { %v313_v48 = vmax.f32 %v310_v45, %v899_v46  ;;  %v311_v49 = vmax.f32 %v308_v35, %v245_v47  ;;  %v995_v35 = vld [vmem:[%s1206_s1 + $0xb0] sm:$0xff]   ;;  %v453_v46 = vsub.s32 1, %v1119_v60 }
 0x10a   :  { %v1004_v45 = vld [vmem:[%s1206_s1 + $0x130] sm:$0xff]  }
 0x10b   :  { %937 = vmatpush3.bf16.msra.mxu0 %v1000_v41 }
 0x10c   :  { %938 = vmatprep.subr.bf16.mxu0 %v1010_v39 }
 0x10d   :  { %v902_v50 = vpop.f32.mrb[12].mxu0 }
 0x10e   :  { %v316_v51 = vmax.f32 %v313_v48, %v902_v50  ;;  %v258_v52 = vpop.f32.mrb[13].mxu0 }
 0x10f   :  { %v314_v53 = vmax.f32 %v311_v49, %v258_v52  ;;  %v903_v54 = vpop.f32.mrb[14].mxu0  ;;  %939 = vmatpush3.bf16.msra.mxu0 %v1001_v42  ;;  %v454_v49 = vrot.slane %v1125_v5, %v453_v46 }
 0x110   :  { %v261_v55 = vpop.f32.mrb[15].mxu0  ;;  %940 = vmatprep.subr.bf16.mxu0 %v1010_v39 }
 0x111   :  { %v317_v56 = vmax.f32 %v314_v53, %v903_v54  ;;  %v315_v57 = vmax.f32 %v312_v43, %v261_v55  ;;  %v1002_v43 = vld [vmem:[%s1206_s1 + $0x120] sm:$0xff]  }
 0x113   :  { %941 = vmatpush3.bf16.msra.mxu0 %v1002_v43 }
 0x114   :  { %942 = vmatprep.subr.bf16.mxu0 %v1010_v39 }
 0x115   :  { %v906_v59 = vpop.f32.mrb[16].mxu0 }
 0x116   :  { %v320_v61 = vmax.f32 %v317_v56, %v906_v59  ;;  %v274_v62 = vpop.f32.mrb[17].mxu0 }
 0x117   :  { %v318_v63 = vmax.f32 %v315_v57, %v274_v62  ;;  %v907_v0 = vpop.f32.mrb[18].mxu0  ;;  %943 = vmatpush3.bf16.msra.mxu0 %v1003_v44  ;;  %v1005_v62 = vld [vmem:[%s1206_s1 + $0x138] sm:$0xff]  }
 0x118   :  { %v277_v1 = vpop.f32.mrb[19].mxu0  ;;  %944 = vmatprep.subr.bf16.mxu0 %v1010_v39 }
 0x119   :  { %v321_v2 = vmax.f32 %v318_v63, %v907_v0  ;;  %v319_v3 = vmax.f32 %v316_v51, %v277_v1  ;;  %v497_v63 = vsub.s32 2, %v1119_v60 }
 0x11b   :  { %945 = vmatpush3.bf16.msra.mxu0 %v1004_v45  ;;  %v498_v1 = vrot.slane %v1125_v5, %v497_v63 }
 0x11c   :  { %946 = vmatprep.subr.bf16.mxu0 %v1010_v39 }
 0x11d   :  { %v910_v6 = vpop.f32.mrb[20].mxu0 }
 0x11e   :  { %v324_v8 = vmax.f32 %v321_v2, %v910_v6  ;;  %v290_v9 = vpop.f32.mrb[21].mxu0 }
 0x11f   :  { %v322_v10 = vmax.f32 %v319_v3, %v290_v9  ;;  %v911_v11 = vpop.f32.mrb[22].mxu0  ;;  %947 = vmatpush3.bf16.msra.mxu0 %v1005_v62 }
 0x120   :  { %v293_v12 = vpop.f32.mrb[23].mxu0  ;;  %v331_v15 = vadd.f32 %v329_v7, %v324_v8 }
 0x121   :  { %v325_v13 = vmax.f32 %v322_v10, %v911_v11  ;;  %v323_v14 = vmax.f32 %v320_v61, %v293_v12  ;;  %v655_v10 = vsub.s32 3, %v1119_v60 }
 0x122   :  { %v334_v20 = vmax.f32 %v331_v15, 0.0 }
 0x123   :  { %v332_v16 = vadd.f32 %v329_v7, %v325_v13  ;;  %v330_v17 = vadd.f32 %v329_v7, %v323_v14  ;;  %v656_v11 = vrot.slane %v1125_v5, %v655_v10 }
 0x125   :  { %v335_v18 = vmax.f32 %v332_v16, 0.0  ;;  %v333_v19 = vmax.f32 %v330_v17, 0.0 }
 0x127   :  { %v337_v21 = vpack.c.bf16 %v335_v18, %v335_v18  ;;  %v336_v22 = vpack.c.bf16 %v334_v20, %v333_v19 }
 0x129   :  { %928 = vmatprep.mubr.bf16.mxu1 %v336_v22 }
 0x12a   :  { %929 = vmatmul.mubr.bf16.vlgmr.msra.gmra.mrb[0].mxu1 %v337_v21 }
 0x12b   :  { %842 = vmatpush3.bf16.msra.mxu1 %v983_v23 }
 0x12c   :  { %843 = vmatprep.subr.bf16.mxu1 %v984_v24 }
 0x12f   :  { %844 = vmatpush3.bf16.msra.mxu1 %v985_v25 }
 0x130   :  { %845 = vmatprep.subr.bf16.mxu1 %v986_v26 }
 0x133   :  { %846 = vmatpush3.bf16.msra.mxu1 %v987_v27 }
 0x134   :  { %847 = vmatprep.subr.bf16.mxu1 %v988_v28 }
 0x137   :  { %848 = vmatpush3.bf16.msra.mxu1 %v989_v29 }
 0x138   :  { %849 = vmatprep.subr.bf16.mxu1 %v990_v30 }
 0x13b   :  { %850 = vmatpush3.bf16.msra.mxu1 %v991_v31 }
 0x13c   :  { %851 = vmatprep.subr.bf16.mxu1 %v992_v32 }
 0x13f   :  { %852 = vmatpush3.bf16.msra.mxu1 %v993_v33 }
 0x140   :  { %853 = vmatprep.subr.bf16.mxu1 %v994_v34 }
 0x143   :  { %854 = vmatpush3.bf16.msra.mxu1 %v995_v35 }
 0x144   :  { %855 = vmatprep.subr.bf16.mxu1 %v996_v36 }
 0x147   :  { %856 = vmatpush3.bf16.msra.mxu1 %v997_v37 }
 0x1fd   :  { %v930_v47 = vpop.f32.mrb[0].mxu1 }
 0x1fe   :  { %v436_v48 = vpop.f32.mrb[1].mxu1 }
 0x1ff   :  { %v450_v50 = vmax.f32 %v436_v48, 0.0  ;;  %v931_v51 = vpop.f32.mrb[2].mxu1 }
 0x200   :  { %v439_v52 = vpop.f32.mrb[3].mxu1 }
 0x201   :  { %v457_v53 = vmax.f32 %v439_v52, %v930_v47  ;;  %v455_v54 = vadd.f32 %v454_v49, %v450_v50 }
 0x203   :  { %v458_v55 = vmax.f32 %v457_v53, 0.0  ;;  %v456_v57 = vmax.f32 %v455_v54, 0.0 }
 0x205   :  { %v459_v56 = vadd.f32 %v458_v55, %v454_v49  ;;  %v461_v61 = vpack.c.bf16 %v456_v57, %v456_v57 }
 0x207   :  { %v460_v58 = vmax.f32 %v459_v56, 0.0 }
 0x209   :  { %v462_v59 = vpack.c.bf16 %v460_v58, %v460_v58 }
 0x20b   :  { %627 = vmatprep.mubr.bf16.mxu1 %v462_v59 }
 0x20c   :  { %628 = vmatmul.mubr.bf16.vlgmr.msra.gmra.mrb[4].mxu1 %v461_v61 }
 0x2df   :  { %v857_v0 = vpop.f32.mrb[4].mxu1 }
 0x2e0   :  { %v858_v2 = vpop.f32.mrb[5].mxu1 }
 0x2e1   :  { %v859_v3 = vadd.f32 %v858_v2, %v857_v0  ;;  %v860_v4 = vpop.f32.mrb[6].mxu1 }
 0x2e2   :  { %v861_v6 = vpop.f32.mrb[7].mxu1 }
 0x2e3   :  { %v630_v7 = vadd.f32 %v859_v3, %v498_v1 }
 0x2e5   :  { %v635_v8 = vmax.f32 %v630_v7, 0.0 }
 0x2e7   :  { %v636_v9 = vpack.c.bf16 %v635_v8, %v635_v8 }
 0x2e9   :  { %949 = vmatmul.mubr.bf16.vlgmr.msra.gmra.mrb[24].mxu0 %v636_v9 }
 0x3bc   :  { %v739_v12 = vpop.f32.mrb[24].mxu0 }
 0x3bd   :  { %v740_v13 = vadd.f32 %v739_v12, %v656_v11  ;;  %v950_v14 = vpop.f32.mrb[25].mxu0 }
 0x3be   :  { %v742_v15 = vpop.f32.mrb[26].mxu0 }
 0x3bf   :  { %745 = vmax.xlane.f32.xlu0 %v740_v13  ;;  %v951_v16 = vpop.f32.mrb[27].mxu0 }
 0x44c   :  { %v746_v17 = vpop.xlane.xlu0 %745 }
 0x44d   :  { %v747_v18 = vsub.f32 %v740_v13, %v746_v17 }
 0x44f   :  { %v748_v19 = vmul.f32 1.442695, %v747_v18 }
 0x451   :  { %1006 = vpow2.f32 %v748_v19 }
 0x45b   :  { %v1007_v20 = vpop.eup %1006 }
 0x45c   :  { %750 = vadd.xlane.f32.xlu0 %v1007_v20 }
 0x4e9   :  { %v751_v21 = vpop.xlane.xlu0 %750 }
 0x4ea   :  { %1008 = vrcp.f32 %v751_v21 }
 0x4f4   :  { %v1009_v22 = vpop.eup %1008 }
 0x4f5   :  { %v753_v23 = vmul.f32 %v1009_v22, %v1007_v20 }
 0x4f7   :  { %754 = vst [vmem:[%s1209_s3] sm:$0xff] %v753_v23 }

</bundles_post_ra>
